<compile_context>
chip_gen: v5e
topology: v5e:2x2
jax: 0.10.0
libtpu: 0.0.40
codegen_flags: <defaults>
</compile_context>

<pallas_src>
import functools

import jax
import jax.numpy as jnp
from jax.experimental import pallas as pl
from jax.experimental.pallas import tpu as pltpu


def _round_up(n: int, m: int) -> int:
    return pl.cdiv(n, m) * m


def _mlp_kernel(num_linear, out_features, matmul_dtype, *refs):
    """refs = (x_ref, w0, b0, w1, b1, ..., w_{n-1}, b_{n-1}, out_ref)."""
    x_ref = refs[0]
    out_ref = refs[-1]
    param_refs = refs[1:-1]

    h = x_ref[...]  # already matmul_dtype (bf16 on the fast path)
    for i in range(num_linear):
        w = param_refs[2 * i][...]       # pre-cast to matmul_dtype in wrapper
        b = param_refs[2 * i + 1][...]   # stays f32 (holds the -1e30 pad bias)
        # astype is a no-op for layer 0 (x already narrow) and for the f32 path;
        # accumulate in f32, keep bias add / ReLU in f32 (v5e VPU has no bf16).
        h = jnp.dot(
            h.astype(matmul_dtype), w, preferred_element_type=jnp.float32
        ) + b
        if i != num_linear - 1:
            h = jnp.maximum(h, 0.0)  # ReLU between hidden layers only

    # Numerically stable softmax over the last (feature) dim.  Padded logits
    # carry a -1e30 f32 bias, so exp underflows to exactly 0 and the
    # normalization equals the softmax over the true features.
    m = jnp.max(h, axis=-1, keepdims=True)
    e = jnp.exp(h - m)
    denom = jnp.sum(e, axis=-1, keepdims=True)
    probs = e / denom  # exact divide: rows sum to 1 to f32 precision

    # Store only the true columns (lane-masked store, but 8x fewer HBM bytes
    # than the zero-padded 128-wide writeback).
    out_ref[...] = probs[:, :out_features].astype(out_ref.dtype)


def mlp_forward(x, weights, biases, *, block_batch=2048,
                matmul_dtype=jnp.bfloat16, lane_pad=128):
    """Fused MLP forward.

    weights[i]: [in_i, out_i] (transposed vs PyTorch's [out, in]),
    biases[i]:  [1, out_i].
    Returns softmax probabilities of shape [batch, out_features] (float32).
    """
    assert len(weights) == len(biases)
    num_linear = len(weights)
    batch, in_features = x.shape
    out_features = weights[-1].shape[1]

    # ---- Pre-cast parameters once in the wrapper (no per-step casts in-kernel).
    weights = [w.astype(matmul_dtype) for w in weights]
    biases = [b.astype(jnp.float32) for b in biases]

    # ---- Pad the final layer to a lane-dense 128-wide COMPUTE tile only.
    padded_out = _round_up(out_features, lane_pad)
    if padded_out != out_features:
        w_last, b_last = weights[-1], biases[-1]
        pad_cols = padded_out - out_features
        w_pad = jnp.zeros((w_last.shape[0], pad_cols), w_last.dtype)
        b_pad = jnp.full((1, pad_cols), -1e30, jnp.float32)  # exp -> 0 (f32!)
        weights[-1] = jnp.concatenate([w_last, w_pad], axis=1)
        biases[-1] = jnp.concatenate([b_last, b_pad], axis=1)

    # ---- Batch tiling: large tiles amortize per-step overhead, but keep >=2
    #      grid steps so the "parallel" axis can shard across v7x's 2 TCs.
    tb = min(block_batch, _round_up(pl.cdiv(batch, 2), 8))
    tb = max(tb, 8)
    padded_batch = _round_up(batch, tb)

    # Stream x narrow (bf16 on the fast path); pad rows if needed.
    x = x.astype(matmul_dtype)
    if padded_batch != batch:
        x = jnp.pad(x, ((0, padded_batch - batch), (0, 0)))

    grid = (padded_batch // tb,)

    # x / out blocks stream over the batch; parameters are pinned (constant
    # block index -> Pallas keeps them VMEM-resident, no re-DMA per step).
    in_specs = [pl.BlockSpec((tb, in_features), lambda i: (i, 0))]
    inputs = [x]
    for w, b in zip(weights, biases):
        in_specs.append(pl.BlockSpec(w.shape, lambda i: (0, 0)))
        in_specs.append(pl.BlockSpec(b.shape, lambda i: (0, 0)))
        inputs.extend([w, b])
    out_spec = pl.BlockSpec((tb, out_features), lambda i: (i, 0))

    # ---- VMEM budget (double-buffered x/out + live f32 intermediates + params),
    #      capped so it is safe on every generation (v7x physical VMEM = 64 MiB).
    x_itemsize = jnp.dtype(matmul_dtype).itemsize
    act_width = max(w.shape[1] for w in weights)
    param_bytes = sum(w.size * w.dtype.itemsize for w in weights) \
        + sum(b.size * b.dtype.itemsize for b in biases)
    vmem_est = (2 * tb * in_features * x_itemsize
                + 2 * tb * out_features * 4
                + 4 * tb * act_width * 4
                + 2 * param_bytes)
    vmem_limit = int(min(max(2 * vmem_est, 16 << 20), 48 << 20))

    # Advisory cost estimate for the XLA scheduler.
    flops = 2 * padded_batch * sum(w.shape[0] * w.shape[1] for w in weights)
    transcendentals = padded_batch * padded_out  # exp
    bytes_accessed = (
        x.size * x.dtype.itemsize
        + param_bytes
        + padded_batch * out_features * 4
    )

    kernel = functools.partial(_mlp_kernel, num_linear, out_features, matmul_dtype)

    out = pl.pallas_call(
        kernel,
        out_shape=jax.ShapeDtypeStruct((padded_batch, out_features), jnp.float32),
        grid=grid,
        in_specs=in_specs,
        out_specs=out_spec,
        compiler_params=pltpu.CompilerParams(
            dimension_semantics=("parallel",),
            vmem_limit_bytes=vmem_limit,
        ),
        cost_estimate=pl.CostEstimate(
            flops=int(flops),
            transcendentals=int(transcendentals),
            bytes_accessed=int(bytes_accessed),
        ),
    )(*inputs)

    # Only a (cheap) row slice remains, and only when the batch was padded.
    return out if padded_batch == batch else out[:batch]


def init_params(layers, key):
    """Deterministic init matching torch.nn.Linear shapes (uniform +/- 1/sqrt(fan_in))."""
    weights, biases = [], []
    for i in range(len(layers) - 1):
        fan_in, fan_out = layers[i], layers[i + 1]
        key, wk, bk = jax.random.split(key, 3)
        bound = 1.0 / jnp.sqrt(fan_in)
        # stored as [in, out] (transpose of PyTorch's [out, in])
        w = jax.random.uniform(wk, (fan_in, fan_out), jnp.float32, -bound, bound)
        b = jax.random.uniform(bk, (1, fan_out), jnp.float32, -bound, bound)
        weights.append(w)
        biases.append(b)
    return weights, biases


def mlp_reference(x, weights, biases):
    """Pure-JAX f32 reference for correctness check."""
    h = x
    n = len(weights)
    for i, (w, b) in enumerate(zip(weights, biases)):
        h = h @ w + b
        if i != n - 1:
            h = jnp.maximum(h, 0.0)
    return jax.nn.softmax(h, axis=-1)


if __name__ == "__main__":
    key = jax.random.PRNGKey(0)

    # Small MLP consistent with the module: layers = [in, hidden, hidden, out].
    layers = [32, 64, 64, 16]
    batch = 256  # small, but exercises the batch-tiled pipeline (grid of 2 steps)

    key, pk, xk = jax.random.split(key, 3)
    weights, biases = init_params(layers, pk)
    x = jax.random.normal(xk, (batch, layers[0]), jnp.float32)

    ref = mlp_reference(x, weights, biases)

    # Fast path: bf16 MXU operands / bf16 x streaming, f32 accumulation.
    out = mlp_forward(x, weights, biases, matmul_dtype=jnp.bfloat16)
    out = jax.block_until_ready(out)
    assert out.shape == (batch, layers[-1])
    assert jnp.allclose(jnp.sum(out, axis=-1), 1.0, atol=1e-3)
    assert jnp.allclose(out, ref, atol=2e-2, rtol=2e-2), "bf16 path mismatch"

    # f32-MXU path: tight check of the kernel semantics vs the reference.
    out_f32 = mlp_forward(x, weights, biases, matmul_dtype=jnp.float32)
    out_f32 = jax.block_until_ready(out_f32)
    assert jnp.allclose(out_f32, ref, atol=2e-3, rtol=2e-3), "f32 path mismatch"
    assert jnp.allclose(jnp.sum(out_f32, axis=-1), 1.0, atol=1e-3)

    print("KERNEL_OK")
</pallas_src>

<mosaic_0001>
module attributes {stable_mosaic.version = 11 : i64} {
  func.func @_mlp_kernel(%arg0: i32, %arg1: memref<128x32xbf16, #tpu.memory_space<vmem>>, %arg2: memref<32x64xbf16, #tpu.memory_space<vmem>>, %arg3: memref<1x64xf32, #tpu.memory_space<vmem>>, %arg4: memref<64x64xbf16, #tpu.memory_space<vmem>>, %arg5: memref<1x64xf32, #tpu.memory_space<vmem>>, %arg6: memref<64x128xbf16, #tpu.memory_space<vmem>>, %arg7: memref<1x128xf32, #tpu.memory_space<vmem>>, %arg8: memref<128x16xf32, #tpu.memory_space<vmem>>) attributes {dimension_semantics = [#tpu.dimension_semantics<parallel>], iteration_bounds = array<i64: 2>, scalar_prefetch = 0 : i64, scratch_operands = 0 : i64, tpu.core_type = #tpu.core_type<tc>, window_params = [{transform_indices = @transform_0, window_bounds = array<i64: 128, 32>}, {pipeline_mode = #tpu.pipeline_mode<synchronous>, transform_indices = @transform_1, window_bounds = array<i64: 32, 64>}, {pipeline_mode = #tpu.pipeline_mode<synchronous>, transform_indices = @transform_2, window_bounds = array<i64: 1, 64>}, {pipeline_mode = #tpu.pipeline_mode<synchronous>, transform_indices = @transform_3, window_bounds = array<i64: 64, 64>}, {pipeline_mode = #tpu.pipeline_mode<synchronous>, transform_indices = @transform_4, window_bounds = array<i64: 1, 64>}, {pipeline_mode = #tpu.pipeline_mode<synchronous>, transform_indices = @transform_5, window_bounds = array<i64: 64, 128>}, {pipeline_mode = #tpu.pipeline_mode<synchronous>, transform_indices = @transform_6, window_bounds = array<i64: 1, 128>}, {transform_indices = @transform_7, window_bounds = array<i64: 128, 16>}]} {
    %c0 = arith.constant 0 : index
    %c0_0 = arith.constant 0 : index
    %0 = vector.load %arg1[%c0, %c0_0] : memref<128x32xbf16, #tpu.memory_space<vmem>>, vector<128x32xbf16>
    %c0_1 = arith.constant 0 : index
    %c0_2 = arith.constant 0 : index
    %1 = vector.load %arg2[%c0_1, %c0_2] : memref<32x64xbf16, #tpu.memory_space<vmem>>, vector<32x64xbf16>
    %c0_3 = arith.constant 0 : index
    %c0_4 = arith.constant 0 : index
    %2 = vector.load %arg3[%c0_3, %c0_4] : memref<1x64xf32, #tpu.memory_space<vmem>>, vector<1x64xf32>
    %cst = arith.constant dense<0.000000e+00> : vector<128x64xf32>
    %3 = tpu.matmul %0, %1, %cst {dimension_numbers = #tpu.dot_dimension_numbers<[1], [0], [0], [1], [0, 0, 1, 1], [], []>} : vector<128x32xbf16>, vector<32x64xbf16>, vector<128x64xf32> -> vector<128x64xf32>
    %4 = vector.broadcast %2 : vector<1x64xf32> to vector<128x64xf32>
    %5 = arith.addf %3, %4 : vector<128x64xf32>
    %cst_5 = arith.constant 0.000000e+00 : f32
    %6 = vector.broadcast %cst_5 : f32 to vector<128x64xf32>
    %7 = arith.maximumf %5, %6 : vector<128x64xf32>
    %c0_6 = arith.constant 0 : index
    %c0_7 = arith.constant 0 : index
    %8 = vector.load %arg4[%c0_6, %c0_7] : memref<64x64xbf16, #tpu.memory_space<vmem>>, vector<64x64xbf16>
    %c0_8 = arith.constant 0 : index
    %c0_9 = arith.constant 0 : index
    %9 = vector.load %arg5[%c0_8, %c0_9] : memref<1x64xf32, #tpu.memory_space<vmem>>, vector<1x64xf32>
    %10 = arith.truncf %7 : vector<128x64xf32> to vector<128x64xbf16>
    %cst_10 = arith.constant dense<0.000000e+00> : vector<128x64xf32>
    %11 = tpu.matmul %10, %8, %cst_10 {dimension_numbers = #tpu.dot_dimension_numbers<[1], [0], [0], [1], [0, 0, 1, 1], [], []>} : vector<128x64xbf16>, vector<64x64xbf16>, vector<128x64xf32> -> vector<128x64xf32>
    %12 = vector.broadcast %9 : vector<1x64xf32> to vector<128x64xf32>
    %13 = arith.addf %11, %12 : vector<128x64xf32>
    %cst_11 = arith.constant 0.000000e+00 : f32
    %14 = vector.broadcast %cst_11 : f32 to vector<128x64xf32>
    %15 = arith.maximumf %13, %14 : vector<128x64xf32>
    %c0_12 = arith.constant 0 : index
    %c0_13 = arith.constant 0 : index
    %16 = vector.load %arg6[%c0_12, %c0_13] : memref<64x128xbf16, #tpu.memory_space<vmem>>, vector<64x128xbf16>
    %c0_14 = arith.constant 0 : index
    %c0_15 = arith.constant 0 : index
    %17 = vector.load %arg7[%c0_14, %c0_15] : memref<1x128xf32, #tpu.memory_space<vmem>>, vector<1x128xf32>
    %18 = arith.truncf %15 : vector<128x64xf32> to vector<128x64xbf16>
    %cst_16 = arith.constant dense<0.000000e+00> : vector<128x128xf32>
    %19 = tpu.matmul %18, %16, %cst_16 {dimension_numbers = #tpu.dot_dimension_numbers<[1], [0], [0], [1], [0, 0, 1, 1], [], []>} : vector<128x64xbf16>, vector<64x128xbf16>, vector<128x128xf32> -> vector<128x128xf32>
    %20 = vector.broadcast %17 : vector<1x128xf32> to vector<128x128xf32>
    %21 = arith.addf %19, %20 : vector<128x128xf32>
    %cst_17 = arith.constant dense<0xFF800000> : vector<128xf32>
    %22 = vector.multi_reduction <maximumf>, %21, %cst_17 [1] : vector<128x128xf32> to vector<128xf32>
    %23 = vector.shape_cast %22 : vector<128xf32> to vector<128x1xf32>
    %24 = vector.broadcast %23 : vector<128x1xf32> to vector<128x128xf32>
    %25 = arith.subf %21, %24 : vector<128x128xf32>
    %26 = math.exp %25 : vector<128x128xf32>
    %cst_18 = arith.constant dense<0.000000e+00> : vector<128xf32>
    %27 = vector.multi_reduction <add>, %26, %cst_18 [1] : vector<128x128xf32> to vector<128xf32>
    %28 = vector.shape_cast %27 : vector<128xf32> to vector<128x1xf32>
    %29 = vector.broadcast %28 : vector<128x1xf32> to vector<128x128xf32>
    %30 = arith.divf %26, %29 : vector<128x128xf32>
    %31 = vector.extract_strided_slice %30 {offsets = [0, 0], sizes = [128, 16], strides = [1, 1]} : vector<128x128xf32> to vector<128x16xf32>
    %c0_19 = arith.constant 0 : index
    %c0_20 = arith.constant 0 : index
    %32 = vector.load %arg8[%c0_19, %c0_20] : memref<128x16xf32, #tpu.memory_space<vmem>>, vector<128x16xf32>
    tpu.vector_store %arg8[%c0_19, %c0_20], %31 {strides = array<i32>} : memref<128x16xf32, #tpu.memory_space<vmem>>, vector<128x16xf32>,
    return
  }
  func.func @transform_0(%arg0: i32) -> (i32, i32) {
    %c0_i32 = arith.constant 0 : i32
    %c0_i32_0 = arith.constant 0 : i32
    return %arg0, %c0_i32 : i32, i32
  }
  func.func @transform_1(%arg0: i32) -> (i32, i32) {
    %c0_i32 = arith.constant 0 : i32
    %c0_i32_0 = arith.constant 0 : i32
    %c0_i32_1 = arith.constant 0 : i32
    return %c0_i32, %c0_i32_0 : i32, i32
  }
  func.func @transform_2(%arg0: i32) -> (i32, i32) {
    %c0_i32 = arith.constant 0 : i32
    %c0_i32_0 = arith.constant 0 : i32
    %c0_i32_1 = arith.constant 0 : i32
    return %c0_i32, %c0_i32_0 : i32, i32
  }
  func.func @transform_3(%arg0: i32) -> (i32, i32) {
    %c0_i32 = arith.constant 0 : i32
    %c0_i32_0 = arith.constant 0 : i32
    %c0_i32_1 = arith.constant 0 : i32
    return %c0_i32, %c0_i32_0 : i32, i32
  }
  func.func @transform_4(%arg0: i32) -> (i32, i32) {
    %c0_i32 = arith.constant 0 : i32
    %c0_i32_0 = arith.constant 0 : i32
    %c0_i32_1 = arith.constant 0 : i32
    return %c0_i32, %c0_i32_0 : i32, i32
  }
  func.func @transform_5(%arg0: i32) -> (i32, i32) {
    %c0_i32 = arith.constant 0 : i32
    %c0_i32_0 = arith.constant 0 : i32
    %c0_i32_1 = arith.constant 0 : i32
    return %c0_i32, %c0_i32_0 : i32, i32
  }
  func.func @transform_6(%arg0: i32) -> (i32, i32) {
    %c0_i32 = arith.constant 0 : i32
    %c0_i32_0 = arith.constant 0 : i32
    %c0_i32_1 = arith.constant 0 : i32
    return %c0_i32, %c0_i32_0 : i32, i32
  }
  func.func @transform_7(%arg0: i32) -> (i32, i32) {
    %c0_i32 = arith.constant 0 : i32
    %c0_i32_0 = arith.constant 0 : i32
    return %arg0, %c0_i32 : i32, i32
  }
}

</mosaic_0001>

<bundles_post_ra>
// kernel: tpu_custom_call.1
= control target key start
LH: loop header
LB: loop body
LE: loop exit
PB: predicated region body
PF: predicated region fallthrough
CT: control target
= control target key end

     0   :  { %s1383_s24 = smov 0   ;;  %s1627_s0 = inlined_call_operand.vmem [shape: bf16[256,32], index: 0, kind: input, shape index: {}]   ;;  %s1628_s1 = inlined_call_operand.vmem [shape: bf16[32,64], index: 1, kind: input, shape index: {}]   ;;  %s1629_s2 = inlined_call_operand.vmem [shape: f32[1,64], index: 2, kind: input, shape index: {}]   ;;  %s1630_s3 = inlined_call_operand.vmem [shape: bf16[64,64], index: 3, kind: input, shape index: {}]   ;;  %s1631_s4 = inlined_call_operand.vmem [shape: f32[1,64], index: 4, kind: input, shape index: {}]   ;;  %s1632_s5 = inlined_call_operand.vmem [shape: bf16[64,128], index: 5, kind: input, shape index: {}]   ;;  %s1633_s6 = inlined_call_operand.vmem [shape: f32[1,128], index: 6, kind: input, shape index: {}]   ;;  %s1634_s7 = inlined_call_operand.vmem [shape: f32[256,16], index: 7, kind: output, shape index: {}]  }
   0x1 LB: > { %s1125_s25 = sadd.s32 4294967295, %s1341_s24   ;;  %p1129_p0 = scmp.ge.s32.totalorder %s1341_s24, 1  ;;  %s1341_s24 = sphi %s1383_s24, %s17_s24  }
   0x2   : > { %p238_p1 = scmp.lt.s32.totalorder %s1341_s24, 3 }
   0x4   : > { %p239_p2 = pnand %p1129_p0, %p238_p1 }
   0x5   : > { %s1130_s28 = sshll.u32 (!%p239_p2), %s1125_s25, 4 }
   0x6   : > { %242 = sbr.rel (%p239_p2) target bundleno = 822 (0x336), region = 48  ;;  %p271_p3 = scmp.lt.s32.totalorder (!%p239_p2), %s1130_s28, 31 }
   0xb   : > { %v1241_v0 = vld [vmem:[%s1628_s1 + $0x8] sm:$0xff]  ;;  %v1240_v1 = vld [vmem:[%s1628_s1] sm:$0xff]  ;;  %s1636_s28 = smov (!%p271_p3, %s1130_s28), 31  ;;  %vm359_vm0 = vcmask 261120   ;;  %v1245_v9 = vld [vmem:[%s1630_s3 + $0x18] sm:$0xff]  ;;  %vm493_vm1 = vcmask 523264  }
   0xc   : > { %390 = vmatpush.bf16.msra.mxu0 %v1241_v0  ;;  %1250 = vmatpush.bf16.msra.mxu3 %v1241_v0  ;;  %s1131_s8 = sshll.u32 %s1636_s28, 2  ;;  %v1244_v11 = vld [vmem:[%s1630_s3 + $0x10] sm:$0xff]  ;;  %v1243_v12 = vld [vmem:[%s1630_s3 + $0x8] sm:$0xff]  ;;  %v1242_v13 = vld [vmem:[%s1630_s3] sm:$0xff]  ;;  %s1133_s13 = sshll.u32 %s1636_s28, 3  ;;  %vm1052_vm6 = vcmask 130048  }
   0xd   : > { %s274_s11 = scalar_lea.vmem %s1627_s0, %s1131_s8  ;;  %522 = vmatpush.bf16.msra.mxu1 %v1245_v9  ;;  %v1426_v15 = vld [vmem:[%s1629_s2] ss:$0 sm:$0xff]  ;;  %v1249_v62 = vld [vmem:[%s1632_s5 + $0x18] sm:$0xff]  ;;  %s1574_s16 = scalar_lea.vmem %s1634_s7, %s1133_s13 }
   0xe   : > { %v1232_v2 = vld [vmem:[%s274_s11] sm:$0xff]  ;;  %v1233_v3 = vld [vmem:[%s274_s11 + $0x8] sm:$0xff]  ;;  %v1234_v4 = vld [vmem:[%s274_s11 + $0x10] sm:$0xff]  ;;  %655 = vmatpush.bf16.msra.mxu2 %v1249_v62 }
   0xf   : > { %v1235_v5 = vld [vmem:[%s274_s11 + $0x18] sm:$0xff]  ;;  %v1236_v6 = vld [vmem:[%s274_s11 + $0x20] sm:$0xff]  ;;  %v1237_v8 = vld [vmem:[%s274_s11 + $0x28] sm:$0xff] }
  0x10   : > { %391 = vmatpush.bf16.msra.mxu0 %v1240_v1  ;;  %1251 = vmatpush.bf16.msra.mxu3 %v1240_v1  ;;  %v1239_v7 = vld [vmem:[%s274_s11 + $0x38] sm:$0xff]  ;;  %v1238_v10 = vld [vmem:[%s274_s11 + $0x30] sm:$0xff] }
  0x11   : > { %523 = vmatpush.bf16.msra.mxu1 %v1244_v11 }
  0x13   : > { %1174 = vmatmul.msk.bf16.vlgmr.msra.gmra.mxu0 %vm359_vm0, %v1232_v2  ;;  %1181 = vmatmul.msk.bf16.vlgmr.msra.gmra.mxu3 %vm359_vm0, %v1239_v7  ;;  %v1248_v2 = vld [vmem:[%s1632_s5 + $0x10] sm:$0xff]  ;;  %v1246_v7 = vld [vmem:[%s1632_s5] sm:$0xff] }
  0x14   : > { %1252 = vmatpush.bf16.msrb.mxu3 %v1245_v9  ;;  %656 = vmatpush.bf16.msra.mxu2 %v1248_v2 }
  0x15   : > { %524 = vmatpush.bf16.msra.mxu1 %v1243_v12 }
  0x18   : > { %1253 = vmatpush.bf16.msrb.mxu3 %v1244_v11 }
  0x19   : > { %525 = vmatpush.bf16.msra.mxu1 %v1242_v13 }
  0x1c   : > { %1254 = vmatpush.bf16.msrb.mxu3 %v1243_v12  ;;  %v1269_v12 = vld [vmem:[%s1631_s4] ss:$0 sm:$0xff] }
  0x20   : > { %1255 = vmatpush.bf16.msrb.mxu3 %v1242_v13 }
  0x23   : > { %1175 = vmatmul.msk.bf16.gmra.mxu0 %vm359_vm0, %v1233_v3 }
  0x24   : > { %1256 = vmatpush.bf16.msra.mxu3 %v1249_v62 }
  0x28   : > { %1257 = vmatpush.bf16.msra.mxu3 %v1248_v2 }
  0x33   : > { %1176 = vmatmul.msk.bf16.gmra.mxu0 %vm359_vm0, %v1234_v4  ;;  %v1247_v4 = vld [vmem:[%s1632_s5 + $0x8] sm:$0xff] }
  0x34   : > { %657 = vmatpush.bf16.msra.mxu2 %v1247_v4  ;;  %1258 = vmatpush.bf16.msra.mxu3 %v1247_v4  ;;  %v1270_v4 = vld [vmem:[%s1633_s6] ss:$0 sm:$0xff] }
  0x38   : > { %658 = vmatpush.bf16.msra.mxu2 %v1246_v7  ;;  %1259 = vmatpush.bf16.msra.mxu3 %v1246_v7 }
  0x43   : > { %1177 = vmatmul.msk.bf16.gmra.mxu0 %vm359_vm0, %v1235_v5 }
  0x53   : > { %1178 = vmatmul.msk.bf16.gmra.mxu0 %vm359_vm0, %v1236_v6 }
  0x63   : > { %1179 = vmatmul.msk.bf16.gmra.mxu0 %vm359_vm0, %v1237_v8 }
  0x73   : > { %1180 = vmatmul.msk.bf16.gmra.mxu0 %vm359_vm0, %v1238_v10 }
  0x90   : > { %v393_v14 = vpop.f32.mrf.mxu0 }
  0x91   : > { %v394_v16 = vadd.f32 %v1426_v15, %v393_v14 }
  0x93   : > { %v433_v19 = vmax.f32 %v394_v16, 0.0 }
  0x96   : > { %v428_v60 = vpop.f32.mrf.mxu3 }
  0x97   : > { %v429_v5 = vadd.f32 %v1426_v15, %v428_v60 }
  0x98   : > { %v395_v17 = vpop.f32.mrf.mxu0 }
  0x99   : > { %v396_v18 = vadd.f32 %v1426_v15, %v395_v17  ;;  %v447_v8 = vmax.f32 %v429_v5, 0.0 }
  0x9b   : > { %v434_v20 = vmax.f32 %v396_v18, 0.0 }
  0x9d   : > { %v458_v21 = vpack.c.bf16 %v434_v20, %v433_v19 }
  0x9e   : > { %v430_v3 = vpop.f32.mrf.mxu3 }
  0x9f   : > { %1198 = vmatmul.msk.bf16.vlgmr.msra.gmra.mxu1 %vm493_vm1, %v458_v21  ;;  %v431_v6 = vadd.f32 %v1426_v15, %v430_v3 }
  0xa0   : > { %v398_v22 = vpop.f32.mrf.mxu0 }
  0xa1   : > { %v399_v23 = vadd.f32 %v1426_v15, %v398_v22  ;;  %v448_v9 = vmax.f32 %v431_v6, 0.0 }
  0xa3   : > { %v435_v26 = vmax.f32 %v399_v23, 0.0  ;;  %v465_v10 = vpack.c.bf16 %v448_v9, %v447_v8 }
  0xa8   : > { %v400_v24 = vpop.f32.mrf.mxu0 }
  0xa9   : > { %v401_v25 = vadd.f32 %v1426_v15, %v400_v24 }
  0xab   : > { %v436_v27 = vmax.f32 %v401_v25, 0.0 }
  0xad   : > { %v459_v28 = vpack.c.bf16 %v436_v27, %v435_v26 }
  0xaf   : > { %1199 = vmatmul.msk.bf16.gmra.mxu1 %vm493_vm1, %v459_v28 }
  0xb0   : > { %v403_v29 = vpop.f32.mrf.mxu0 }
  0xb1   : > { %v404_v30 = vadd.f32 %v1426_v15, %v403_v29 }
  0xb3   : > { %v437_v33 = vmax.f32 %v404_v30, 0.0 }
  0xb8   : > { %v405_v31 = vpop.f32.mrf.mxu0 }
  0xb9   : > { %v406_v32 = vadd.f32 %v1426_v15, %v405_v31 }
  0xbb   : > { %v438_v34 = vmax.f32 %v406_v32, 0.0 }
  0xbd   : > { %v460_v35 = vpack.c.bf16 %v438_v34, %v437_v33 }
  0xbf   : > { %1200 = vmatmul.msk.bf16.gmra.mxu1 %vm493_vm1, %v460_v35 }
  0xc0   : > { %v408_v36 = vpop.f32.mrf.mxu0 }
  0xc1   : > { %v409_v37 = vadd.f32 %v1426_v15, %v408_v36 }
  0xc3   : > { %v439_v40 = vmax.f32 %v409_v37, 0.0 }
  0xc8   : > { %v410_v38 = vpop.f32.mrf.mxu0 }
  0xc9   : > { %v411_v39 = vadd.f32 %v1426_v15, %v410_v38 }
  0xcb   : > { %v440_v41 = vmax.f32 %v411_v39, 0.0 }
  0xcd   : > { %v461_v42 = vpack.c.bf16 %v440_v41, %v439_v40 }
  0xcf   : > { %1201 = vmatmul.msk.bf16.gmra.mxu1 %vm493_vm1, %v461_v42 }
  0xd0   : > { %v413_v43 = vpop.f32.mrf.mxu0 }
  0xd1   : > { %v414_v44 = vadd.f32 %v1426_v15, %v413_v43 }
  0xd3   : > { %v441_v47 = vmax.f32 %v414_v44, 0.0 }
  0xd8   : > { %v415_v45 = vpop.f32.mrf.mxu0 }
  0xd9   : > { %v416_v46 = vadd.f32 %v1426_v15, %v415_v45 }
  0xdb   : > { %v442_v48 = vmax.f32 %v416_v46, 0.0 }
  0xdd   : > { %v462_v49 = vpack.c.bf16 %v442_v48, %v441_v47 }
  0xdf   : > { %1202 = vmatmul.msk.bf16.gmra.mxu1 %vm493_vm1, %v462_v49 }
  0xe0   : > { %v418_v50 = vpop.f32.mrf.mxu0 }
  0xe1   : > { %v419_v51 = vadd.f32 %v1426_v15, %v418_v50 }
  0xe3   : > { %v443_v54 = vmax.f32 %v419_v51, 0.0 }
  0xe8   : > { %v420_v52 = vpop.f32.mrf.mxu0 }
  0xe9   : > { %v421_v53 = vadd.f32 %v1426_v15, %v420_v52 }
  0xeb   : > { %v444_v55 = vmax.f32 %v421_v53, 0.0 }
  0xed   : > { %v463_v56 = vpack.c.bf16 %v444_v55, %v443_v54 }
  0xef   : > { %1203 = vmatmul.msk.bf16.gmra.mxu1 %vm493_vm1, %v463_v56 }
  0xf0   : > { %v423_v57 = vpop.f32.mrf.mxu0 }
  0xf1   : > { %v424_v58 = vadd.f32 %v1426_v15, %v423_v57 }
  0xf3   : > { %v445_v63 = vmax.f32 %v424_v58, 0.0 }
  0xf8   : > { %v425_v59 = vpop.f32.mrf.mxu0 }
  0xf9   : > { %v426_v61 = vadd.f32 %v1426_v15, %v425_v59 }
  0xfb   : > { %v446_v0 = vmax.f32 %v426_v61, 0.0 }
  0xfd   : > { %v464_v1 = vpack.c.bf16 %v446_v0, %v445_v63 }
  0xff   : > { %1204 = vmatmul.msk.bf16.vlgmr.msrb.gmra.mxu3 %vm493_vm1, %v464_v1 }
 0x10f   : > { %1205 = vmatmul.msk.bf16.gmra.mxu3 %vm493_vm1, %v465_v10 }
 0x11c   : > { %v527_v11 = vpop.f32.mrf.mxu1 }
 0x11d   : > { %v528_v13 = vadd.f32 %v1269_v12, %v527_v11 }
 0x11f   : > { %v567_v15 = vmax.f32 %v528_v13, 0.0 }
 0x124   : > { %v529_v14 = vpop.f32.mrf.mxu1 }
 0x125   : > { %v530_v16 = vadd.f32 %v1269_v12, %v529_v14 }
 0x127   : > { %v568_v17 = vmax.f32 %v530_v16, 0.0 }
 0x129   : > { %v592_v18 = vpack.c.bf16 %v568_v17, %v567_v15 }
 0x12b   : > { %1222 = vmatmul.msk.bf16.vlgmr.msra.gmra.mxu2 %vm493_vm1, %v592_v18 }
 0x12c   : > { %v532_v19 = vpop.f32.mrf.mxu1 }
 0x12d   : > { %v533_v20 = vadd.f32 %v1269_v12, %v532_v19 }
 0x12f   : > { %v569_v23 = vmax.f32 %v533_v20, 0.0 }
 0x134   : > { %v534_v21 = vpop.f32.mrf.mxu1 }
 0x135   : > { %v535_v22 = vadd.f32 %v1269_v12, %v534_v21 }
 0x137   : > { %v570_v24 = vmax.f32 %v535_v22, 0.0 }
 0x139   : > { %v593_v25 = vpack.c.bf16 %v570_v24, %v569_v23 }
 0x13b   : > { %1223 = vmatmul.msk.bf16.gmra.mxu2 %vm493_vm1, %v593_v25 }
 0x13c   : > { %v537_v26 = vpop.f32.mrf.mxu1 }
 0x13d   : > { %v538_v27 = vadd.f32 %v1269_v12, %v537_v26 }
 0x13f   : > { %v571_v30 = vmax.f32 %v538_v27, 0.0 }
 0x144   : > { %v539_v28 = vpop.f32.mrf.mxu1 }
 0x145   : > { %v540_v29 = vadd.f32 %v1269_v12, %v539_v28 }
 0x147   : > { %v572_v31 = vmax.f32 %v540_v29, 0.0 }
 0x149   : > { %v594_v32 = vpack.c.bf16 %v572_v31, %v571_v30 }
 0x14b   : > { %1224 = vmatmul.msk.bf16.gmra.mxu2 %vm493_vm1, %v594_v32 }
 0x14c   : > { %v542_v33 = vpop.f32.mrf.mxu1 }
 0x14d   : > { %v543_v34 = vadd.f32 %v1269_v12, %v542_v33 }
 0x14f   : > { %v573_v37 = vmax.f32 %v543_v34, 0.0 }
 0x154   : > { %v544_v35 = vpop.f32.mrf.mxu1 }
 0x155   : > { %v545_v36 = vadd.f32 %v1269_v12, %v544_v35 }
 0x157   : > { %v574_v38 = vmax.f32 %v545_v36, 0.0 }
 0x159   : > { %v595_v39 = vpack.c.bf16 %v574_v38, %v573_v37 }
 0x15b   : > { %1225 = vmatmul.msk.bf16.gmra.mxu2 %vm493_vm1, %v595_v39 }
 0x15c   : > { %v547_v40 = vpop.f32.mrf.mxu1 }
 0x15d   : > { %v548_v41 = vadd.f32 %v1269_v12, %v547_v40 }
 0x15f   : > { %v575_v44 = vmax.f32 %v548_v41, 0.0 }
 0x164   : > { %v549_v42 = vpop.f32.mrf.mxu1 }
 0x165   : > { %v550_v43 = vadd.f32 %v1269_v12, %v549_v42 }
 0x167   : > { %v576_v45 = vmax.f32 %v550_v43, 0.0 }
 0x169   : > { %v596_v46 = vpack.c.bf16 %v576_v45, %v575_v44 }
 0x16b   : > { %1226 = vmatmul.msk.bf16.gmra.mxu2 %vm493_vm1, %v596_v46 }
 0x16c   : > { %v552_v47 = vpop.f32.mrf.mxu1 }
 0x16d   : > { %v553_v48 = vadd.f32 %v1269_v12, %v552_v47 }
 0x16f   : > { %v577_v51 = vmax.f32 %v553_v48, 0.0 }
 0x174   : > { %v554_v49 = vpop.f32.mrf.mxu1 }
 0x175   : > { %v555_v50 = vadd.f32 %v1269_v12, %v554_v49 }
 0x177   : > { %v578_v52 = vmax.f32 %v555_v50, 0.0 }
 0x179   : > { %v597_v53 = vpack.c.bf16 %v578_v52, %v577_v51 }
 0x17b   : > { %1227 = vmatmul.msk.bf16.gmra.mxu2 %vm493_vm1, %v597_v53 }
 0x182   : > { %v557_v54 = vpop.f32.mrf.mxu3 }
 0x183   : > { %v558_v55 = vadd.f32 %v1269_v12, %v557_v54 }
 0x185   : > { %v579_v58 = vmax.f32 %v558_v55, 0.0 }
 0x18a   : > { %v559_v56 = vpop.f32.mrf.mxu3 }
 0x18b   : > { %v560_v57 = vadd.f32 %v1269_v12, %v559_v56 }
 0x18d   : > { %v580_v59 = vmax.f32 %v560_v57, 0.0 }
 0x18f   : > { %v598_v60 = vpack.c.bf16 %v580_v59, %v579_v58 }
 0x191   : > { %1228 = vmatmul.msk.bf16.vlgmr.msra.gmra.mxu3 %vm493_vm1, %v598_v60 }
 0x192   : > { %v562_v61 = vpop.f32.mrf.mxu3 }
 0x193   : > { %v563_v62 = vadd.f32 %v1269_v12, %v562_v61 }
 0x195   : > { %v581_v1 = vmax.f32 %v563_v62, 0.0 }
 0x19a   : > { %v564_v63 = vpop.f32.mrf.mxu3 }
 0x19b   : > { %v565_v0 = vadd.f32 %v1269_v12, %v564_v63 }
 0x19d   : > { %v582_v2 = vmax.f32 %v565_v0, 0.0 }
 0x19f   : > { %v599_v3 = vpack.c.bf16 %v582_v2, %v581_v1 }
 0x1a1   : > { %1229 = vmatmul.msk.bf16.gmra.mxu3 %vm493_vm1, %v599_v3 }
 0x1ae   : > { %v660_v5 = vpop.f32.mrf.mxu2 }
 0x1af   : > { %v661_v6 = vadd.f32 %v1270_v4, %v660_v5 }
 0x1b1   : > { %700 = vmax.xlane.f32.xlu0 %v661_v6 }
 0x1b6   : > { %v662_v7 = vpop.f32.mrf.mxu2 }
 0x1b7   : > { %v663_v8 = vadd.f32 %v1270_v4, %v662_v7 }
 0x1b9   : > { %702 = vmax.xlane.f32.xlu0 %v663_v8 }
 0x1be   : > { %v665_v9 = vpop.f32.mrf.mxu2 }
 0x1bf   : > { %v666_v10 = vadd.f32 %v1270_v4, %v665_v9 }
 0x1c1   : > { %704 = vmax.xlane.f32.xlu1 %v666_v10 }
 0x1c6   : > { %v667_v11 = vpop.f32.mrf.mxu2 }
 0x1c7   : > { %v668_v12 = vadd.f32 %v1270_v4, %v667_v11 }
 0x1c9   : > { %706 = vmax.xlane.f32.xlu1 %v668_v12 }
 0x1ce   : > { %v670_v13 = vpop.f32.mrf.mxu2 }
 0x1cf   : > { %v671_v14 = vadd.f32 %v1270_v4, %v670_v13 }
 0x1d1   : > { %708 = vmax.xlane.f32.xlu2 %v671_v14 }
 0x1d6   : > { %v672_v16 = vpop.f32.mrf.mxu2 }
 0x1d7   : > { %v1478_v15 = vadd.f32 %v1270_v4, %v672_v16 }
 0x1d9   : > { %710 = vmax.xlane.f32.xlu2 %v1478_v15 }
 0x1de   : > { %v675_v17 = vpop.f32.mrf.mxu2 }
 0x1df   : > { %v1481_v18 = vadd.f32 %v1270_v4, %v675_v17 }
 0x1e1   : > { %712 = vmax.xlane.f32.xlu0 %v1481_v18 }
 0x1e6   : > { %v677_v19 = vpop.f32.mrf.mxu2 }
 0x1e7   : > { %v1484_v20 = vadd.f32 %v1270_v4, %v677_v19 }
 0x1e9   : > { %714 = vmax.xlane.f32.xlu1 %v1484_v20 }
 0x1ee   : > { %v680_v21 = vpop.f32.mrf.mxu2 }
 0x1ef   : > { %v1487_v22 = vadd.f32 %v1270_v4, %v680_v21 }
 0x1f1   : > { %716 = vmax.xlane.f32.xlu2 %v1487_v22 }
 0x1f6   : > { %v682_v23 = vpop.f32.mrf.mxu2 }
 0x1f7   : > { %v1490_v24 = vadd.f32 %v1270_v4, %v682_v23 }
 0x1f9   : > { %718 = vmax.xlane.f32.xlu0 %v1490_v24 }
 0x1fe   : > { %v685_v25 = vpop.f32.mrf.mxu2 }
 0x1ff   : > { %v1493_v26 = vadd.f32 %v1270_v4, %v685_v25 }
 0x201   : > { %720 = vmax.xlane.f32.xlu1 %v1493_v26 }
 0x206   : > { %v687_v27 = vpop.f32.mrf.mxu2 }
 0x207   : > { %v1496_v28 = vadd.f32 %v1270_v4, %v687_v27 }
 0x209   : > { %722 = vmax.xlane.f32.xlu2 %v1496_v28 }
 0x214   : > { %v690_v29 = vpop.f32.mrf.mxu3 }
 0x215   : > { %v1499_v30 = vadd.f32 %v1270_v4, %v690_v29 }
 0x217   : > { %724 = vmax.xlane.f32.xlu0 %v1499_v30 }
 0x21c   : > { %v692_v31 = vpop.f32.mrf.mxu3 }
 0x21d   : > { %v1502_v32 = vadd.f32 %v1270_v4, %v692_v31 }
 0x21f   : > { %726 = vmax.xlane.f32.xlu1 %v1502_v32 }
 0x224   : > { %v695_v33 = vpop.f32.mrf.mxu3  ;;  %v701_v34 = vpop.xlane.xlu0 %700 }
 0x225   : > { %v1505_v35 = vadd.f32 %v1270_v4, %v695_v33  ;;  %v732_v36 = vsub.f32 %v661_v6, %v701_v34 }
 0x227   : > { %v748_v37 = vmul.f32 1.442695, %v732_v36  ;;  %728 = vmax.xlane.f32.xlu2 %v1505_v35 }
 0x229   : > { %1271 = vpow2.f32 %v748_v37 }
 0x22c   : > { %v697_v38 = vpop.f32.mrf.mxu3  ;;  %v703_v39 = vpop.xlane.xlu0 %702 }
 0x22d   : > { %v1508_v40 = vadd.f32 %v1270_v4, %v697_v38  ;;  %v733_v41 = vsub.f32 %v663_v8, %v703_v39 }
 0x22f   : > { %v1510_v42 = vpop.eup %1271  ;;  %v750_v43 = vmul.f32 1.442695, %v733_v41  ;;  %730 = vmax.xlane.f32.xlu0 %v1508_v40 }
 0x230   : > { %780 = vadd.xlane.f32.xlu1 %v1510_v42 }
 0x231   : > { %1273 = vpow2.f32 %v750_v43 }
 0x234   : > { %v705_v44 = vpop.xlane.xlu1 %704 }
 0x235   : > { %v734_v45 = vsub.f32 %v666_v10, %v705_v44 }
 0x237   : > { %v1514_v46 = vpop.eup %1273  ;;  %v752_v47 = vmul.f32 1.442695, %v734_v45 }
 0x238   : > { %782 = vadd.xlane.f32.xlu2 %v1514_v46 }
 0x239   : > { %1275 = vpow2.f32 %v752_v47 }
 0x23c   : > { %v707_v48 = vpop.xlane.xlu1 %706 }
 0x23d   : > { %v735_v49 = vsub.f32 %v668_v12, %v707_v48 }
 0x23f   : > { %v1517_v50 = vpop.eup %1275  ;;  %v754_v51 = vmul.f32 1.442695, %v735_v49 }
 0x240   : > { %784 = vadd.xlane.f32.xlu0 %v1517_v50 }
 0x241   : > { %1277 = vpow2.f32 %v754_v51 }
 0x244   : > { %v709_v52 = vpop.xlane.xlu2 %708 }
 0x245   : > { %v736_v53 = vsub.f32 %v671_v14, %v709_v52 }
 0x247   : > { %v1520_v54 = vpop.eup %1277  ;;  %v756_v55 = vmul.f32 1.442695, %v736_v53 }
 0x248   : > { %786 = vadd.xlane.f32.xlu1 %v1520_v54 }
 0x249   : > { %1279 = vpow2.f32 %v756_v55 }
 0x24c   : > { %v711_v56 = vpop.xlane.xlu2 %710 }
 0x24d   : > { %v737_v57 = vsub.f32 %v1478_v15, %v711_v56 }
 0x24f   : > { %v1524_v58 = vpop.eup %1279  ;;  %v758_v59 = vmul.f32 1.442695, %v737_v57 }
 0x250   : > { %788 = vadd.xlane.f32.xlu2 %v1524_v58 }
 0x251   : > { %1281 = vpow2.f32 %v758_v59 }
 0x254   : > { %v713_v60 = vpop.xlane.xlu0 %712 }
 0x255   : > { %v738_v61 = vsub.f32 %v1481_v18, %v713_v60 }
 0x257   : > { %v1528_v62 = vpop.eup %1281  ;;  %v760_v63 = vmul.f32 1.442695, %v738_v61 }
 0x258   : > { %790 = vadd.xlane.f32.xlu0 %v1528_v62 }
 0x259   : > { %1283 = vpow2.f32 %v760_v63 }
 0x25c   : > { %v715_v0 = vpop.xlane.xlu1 %714 }
 0x25d   : > { %v739_v1 = vsub.f32 %v1484_v20, %v715_v0 }
 0x25f   : > { %v1532_v2 = vpop.eup %1283  ;;  %v762_v3 = vmul.f32 1.442695, %v739_v1 }
 0x260   : > { %792 = vadd.xlane.f32.xlu1 %v1532_v2 }
 0x261   : > { %1285 = vpow2.f32 %v762_v3 }
 0x264   : > { %v717_v4 = vpop.xlane.xlu2 %716 }
 0x265   : > { %v740_v5 = vsub.f32 %v1487_v22, %v717_v4 }
 0x267   : > { %v1536_v6 = vpop.eup %1285  ;;  %v764_v7 = vmul.f32 1.442695, %v740_v5 }
 0x268   : > { %794 = vadd.xlane.f32.xlu2 %v1536_v6 }
 0x269   : > { %1287 = vpow2.f32 %v764_v7 }
 0x26c   : > { %v719_v8 = vpop.xlane.xlu0 %718 }
 0x26d   : > { %v741_v9 = vsub.f32 %v1490_v24, %v719_v8 }
 0x26f   : > { %v1540_v10 = vpop.eup %1287  ;;  %v766_v11 = vmul.f32 1.442695, %v741_v9 }
 0x270   : > { %796 = vadd.xlane.f32.xlu0 %v1540_v10 }
 0x271   : > { %1289 = vpow2.f32 %v766_v11 }
 0x274   : > { %v721_v12 = vpop.xlane.xlu1 %720 }
 0x275   : > { %v742_v13 = vsub.f32 %v1493_v26, %v721_v12 }
 0x277   : > { %v1544_v14 = vpop.eup %1289  ;;  %v768_v16 = vmul.f32 1.442695, %v742_v13 }
 0x278   : > { %798 = vadd.xlane.f32.xlu1 %v1544_v14 }
 0x279   : > { %1291 = vpow2.f32 %v768_v16 }
 0x27c   : > { %v723_v15 = vpop.xlane.xlu2 %722 }
 0x27d   : > { %v743_v17 = vsub.f32 %v1496_v28, %v723_v15 }
 0x27f   : > { %v1548_v18 = vpop.eup %1291  ;;  %v770_v19 = vmul.f32 1.442695, %v743_v17 }
 0x280   : > { %800 = vadd.xlane.f32.xlu2 %v1548_v18 }
 0x281   : > { %1293 = vpow2.f32 %v770_v19 }
 0x287   : > { %v1551_v20 = vpop.eup %1293 }
 0x288   : > { %802 = vadd.xlane.f32.xlu0 %v1551_v20 }
 0x28a   : > { %v725_v21 = vpop.xlane.xlu0 %724 }
 0x28b   : > { %v744_v22 = vsub.f32 %v1499_v30, %v725_v21 }
 0x28d   : > { %v772_v23 = vmul.f32 1.442695, %v744_v22 }
 0x28f   : > { %1295 = vpow2.f32 %v772_v23 }
 0x292   : > { %v727_v24 = vpop.xlane.xlu1 %726 }
 0x293   : > { %v745_v25 = vsub.f32 %v1502_v32, %v727_v24 }
 0x295   : > { %v1556_v26 = vpop.eup %1295  ;;  %v774_v27 = vmul.f32 1.442695, %v745_v25 }
 0x296   : > { %804 = vadd.xlane.f32.xlu1 %v1556_v26 }
 0x297   : > { %1297 = vpow2.f32 %v774_v27 }
 0x29a   : > { %v729_v28 = vpop.xlane.xlu2 %728 }
 0x29b   : > { %v746_v29 = vsub.f32 %v1505_v35, %v729_v28 }
 0x29d   : > { %v1560_v31 = vpop.eup %1297  ;;  %v776_v33 = vmul.f32 1.442695, %v746_v29 }
 0x29e   : > { %806 = vadd.xlane.f32.xlu2 %v1560_v31 }
 0x29f   : > { %1299 = vpow2.f32 %v776_v33 }
 0x2a2   : > { %v731_v30 = vpop.xlane.xlu0 %730 }
 0x2a3   : > { %v747_v34 = vsub.f32 %v1508_v40, %v731_v30  ;;  %v781_v36 = vpop.xlane.xlu1 %780 }
 0x2a4   : > { %1301 = vrcp.f32 %v781_v36  ;;  %v823_v44 = vand.u32 2147483648, %v781_v36  ;;  %v821_v45 = vand.u32 2147483647, %v781_v36  ;;  %vm817_vm3 = vweird.f32 %v781_v36 }
 0x2a5   : > { %v1564_v32 = vpop.eup %1299  ;;  %v778_v37 = vmul.f32 1.442695, %v747_v34 }
 0x2a6   : > { %808 = vadd.xlane.f32.xlu0 %v1564_v32  ;;  %v824_v49 = vor.u32 1.1754944e-38, %v823_v44  ;;  %vm822_vm5 = vcmp.eq.f32.partialorder %v821_v45, 8.507059e+37 }
 0x2a7   : > { %1303 = vpow2.f32 %v778_v37 }
 0x2aa   : > { %v1302_v38 = vpop.eup %1301 }
 0x2ab   : > { %v813_v35 = vmul.f32 %v1302_v38, %v781_v36  ;;  %v783_v39 = vpop.xlane.xlu2 %782  ;;  %vm818_vm2 = vweird.f32 %v1302_v38 }
 0x2ac   : > { %1305 = vrcp.f32 %v783_v39  ;;  %vm819_vm4 = vmor %vm817_vm3, %vm818_vm2  ;;  %v838_v59 = vand.u32 2147483648, %v783_v39  ;;  %v836_v61 = vand.u32 2147483647, %v783_v39  ;;  %vm832_vm8 = vweird.f32 %v783_v39 }
 0x2ad   : > { %v1567_v41 = vpop.eup %1303  ;;  %v814_v43 = vsub.f32 1.0, %v813_v35 }
 0x2ae   : > { %810 = vadd.xlane.f32.xlu1 %v1567_v41  ;;  %v839_v1 = vor.u32 1.1754944e-38, %v838_v59  ;;  %vm837_vm10 = vcmp.eq.f32.partialorder %v836_v61, 8.507059e+37 }
 0x2af   : > { %v815_v40 = vmul.f32 %v1302_v38, %v814_v43 }
 0x2b1   : > { %v816_v47 = vadd.f32 %v1302_v38, %v815_v40 }
 0x2b2   : > { %v1306_v48 = vpop.eup %1305 }
 0x2b3   : > { %v820_v51 = vsel %vm819_vm4, %v1302_v38, %v816_v47  ;;  %v828_v52 = vmul.f32 %v1306_v48, %v783_v39  ;;  %v785_v53 = vpop.xlane.xlu0 %784  ;;  %vm833_vm7 = vweird.f32 %v1306_v48 }
 0x2b4   : > { %v825_v55 = vsel %vm822_vm5, %v824_v49, %v820_v51  ;;  %1307 = vrcp.f32 %v785_v53  ;;  %vm834_vm9 = vmor %vm832_vm8, %vm833_vm7  ;;  %v853_v9 = vand.u32 2147483648, %v785_v53  ;;  %v851_v12 = vand.u32 2147483647, %v785_v53 }
 0x2b5   : > { %v826_v56 = vmul.f32 %v1510_v42, %v825_v55  ;;  %v829_v57 = vsub.f32 1.0, %v828_v52  ;;  %vm847_vm12 = vweird.f32 %v785_v53 }
 0x2b6   : > { %v854_v15 = vor.u32 1.1754944e-38, %v853_v9  ;;  %vm852_vm14 = vcmp.eq.f32.partialorder %v851_v12, 8.507059e+37 }
 0x2b7   : > { %1053 = vst.msk [vmem:[%s1574_s16] sm:$0xff] %vm1052_vm6, %v826_v56  ;;  %v830_v60 = vmul.f32 %v1306_v48, %v829_v57 }
 0x2b9   : > { %v831_v63 = vadd.f32 %v1306_v48, %v830_v60 }
 0x2ba   : > { %v1308_v0 = vpop.eup %1307 }
 0x2bb   : > { %v835_v3 = vsel %vm834_vm9, %v1306_v48, %v831_v63  ;;  %v843_v4 = vmul.f32 %v1308_v0, %v785_v53  ;;  %v787_v5 = vpop.xlane.xlu1 %786  ;;  %vm848_vm11 = vweird.f32 %v1308_v0 }
 0x2bc   : > { %v840_v7 = vsel %vm837_vm10, %v839_v1, %v835_v3  ;;  %1309 = vrcp.f32 %v787_v5  ;;  %vm849_vm13 = vmor %vm847_vm12, %vm848_vm11  ;;  %v868_v24 = vand.u32 2147483648, %v787_v5  ;;  %v866_v27 = vand.u32 2147483647, %v787_v5 }
 0x2bd   : > { %v841_v42 = vmul.f32 %v1514_v46, %v840_v7  ;;  %v844_v8 = vsub.f32 1.0, %v843_v4  ;;  %vm862_vm0 = vweird.f32 %v787_v5 }
 0x2be   : > { %v869_v33 = vor.u32 1.1754944e-38, %v868_v24  ;;  %vm867_vm2 = vcmp.eq.f32.partialorder %v866_v27, 8.507059e+37 }
 0x2bf   : > { %1054 = vst.msk [vmem:[%s1574_s16 + $0x8] sm:$0xff] %vm1052_vm6, %v841_v42  ;;  %v845_v11 = vmul.f32 %v1308_v0, %v844_v8 }
 0x2c1   : > { %v846_v13 = vadd.f32 %v1308_v0, %v845_v11 }
 0x2c2   : > { %v1310_v16 = vpop.eup %1309 }
 0x2c3   : > { %v850_v17 = vsel %vm849_vm13, %v1308_v0, %v846_v13  ;;  %v858_v19 = vmul.f32 %v1310_v16, %v787_v5  ;;  %v789_v21 = vpop.xlane.xlu2 %788  ;;  %vm863_vm15 = vweird.f32 %v1310_v16 }
 0x2c4   : > { %v855_v22 = vsel %vm852_vm14, %v854_v15, %v850_v17  ;;  %1311 = vrcp.f32 %v789_v21  ;;  %vm864_vm1 = vmor %vm862_vm0, %vm863_vm15  ;;  %v883_v35 = vand.u32 2147483648, %v789_v21  ;;  %v881_v43 = vand.u32 2147483647, %v789_v21 }
 0x2c5   : > { %v856_v46 = vmul.f32 %v1517_v50, %v855_v22  ;;  %v859_v23 = vsub.f32 1.0, %v858_v19  ;;  %vm877_vm4 = vweird.f32 %v789_v21 }
 0x2c6   : > { %v884_v45 = vor.u32 1.1754944e-38, %v883_v35  ;;  %vm882_vm7 = vcmp.eq.f32.partialorder %v881_v43, 8.507059e+37 }
 0x2c7   : > { %1055 = vst.msk [vmem:[%s1574_s16 + $0x10] sm:$0xff] %vm1052_vm6, %v856_v46  ;;  %v860_v25 = vmul.f32 %v1310_v16, %v859_v23 }
 0x2c9   : > { %v861_v28 = vadd.f32 %v1310_v16, %v860_v25 }
 0x2ca   : > { %v1312_v29 = vpop.eup %1311 }
 0x2cb   : > { %v865_v30 = vsel %vm864_vm1, %v1310_v16, %v861_v28  ;;  %v873_v34 = vmul.f32 %v1312_v29, %v789_v21  ;;  %v791_v36 = vpop.xlane.xlu0 %790  ;;  %vm878_vm3 = vweird.f32 %v1312_v29 }
 0x2cc   : > { %v870_v37 = vsel %vm867_vm2, %v869_v33, %v865_v30  ;;  %1313 = vrcp.f32 %v791_v36  ;;  %vm879_vm5 = vmor %vm877_vm4, %vm878_vm3  ;;  %v898_v53 = vand.u32 2147483648, %v791_v36  ;;  %v896_v56 = vand.u32 2147483647, %v791_v36 }
 0x2cd   : > { %v871_v50 = vmul.f32 %v1520_v54, %v870_v37  ;;  %v874_v38 = vsub.f32 1.0, %v873_v34  ;;  %vm892_vm9 = vweird.f32 %v791_v36 }
 0x2ce   : > { %v899_v60 = vor.u32 1.1754944e-38, %v898_v53  ;;  %vm897_vm11 = vcmp.eq.f32.partialorder %v896_v56, 8.507059e+37 }
 0x2cf   : > { %1056 = vst.msk [vmem:[%s1574_s16 + $0x18] sm:$0xff] %vm1052_vm6, %v871_v50  ;;  %v875_v39 = vmul.f32 %v1312_v29, %v874_v38 }
 0x2d1   : > { %v876_v44 = vadd.f32 %v1312_v29, %v875_v39 }
 0x2d2   : > { %v1314_v40 = vpop.eup %1313 }
 0x2d3   : > { %v880_v47 = vsel %vm879_vm5, %v1312_v29, %v876_v44  ;;  %v888_v48 = vmul.f32 %v1314_v40, %v791_v36  ;;  %v793_v49 = vpop.xlane.xlu1 %792  ;;  %vm893_vm8 = vweird.f32 %v1314_v40 }
 0x2d4   : > { %v885_v51 = vsel %vm882_vm7, %v884_v45, %v880_v47  ;;  %1315 = vrcp.f32 %v793_v49  ;;  %vm894_vm10 = vmor %vm892_vm9, %vm893_vm8  ;;  %v913_v4 = vand.u32 2147483648, %v793_v49  ;;  %v911_v7 = vand.u32 2147483647, %v793_v49 }
 0x2d5   : > { %v886_v54 = vmul.f32 %v1524_v58, %v885_v51  ;;  %v889_v52 = vsub.f32 1.0, %v888_v48  ;;  %vm907_vm13 = vweird.f32 %v793_v49 }
 0x2d6   : > { %v914_v9 = vor.u32 1.1754944e-38, %v913_v4  ;;  %vm912_vm15 = vcmp.eq.f32.partialorder %v911_v7, 8.507059e+37 }
 0x2d7   : > { %1057 = vst.msk [vmem:[%s1574_s16 + $0x20] sm:$0xff] %vm1052_vm6, %v886_v54  ;;  %v890_v55 = vmul.f32 %v1314_v40, %v889_v52 }
 0x2d9   : > { %v891_v57 = vadd.f32 %v1314_v40, %v890_v55 }
 0x2da   : > { %v1316_v59 = vpop.eup %1315 }
 0x2db   : > { %v895_v61 = vsel %vm894_vm10, %v1314_v40, %v891_v57  ;;  %v903_v63 = vmul.f32 %v1316_v59, %v793_v49  ;;  %v795_v0 = vpop.xlane.xlu2 %794  ;;  %vm908_vm12 = vweird.f32 %v1316_v59 }
 0x2dc   : > { %v900_v1 = vsel %vm897_vm11, %v899_v60, %v895_v61  ;;  %1317 = vrcp.f32 %v795_v0  ;;  %vm909_vm14 = vmor %vm907_vm13, %vm908_vm12  ;;  %v928_v17 = vand.u32 2147483648, %v795_v0  ;;  %v926_v21 = vand.u32 2147483647, %v795_v0 }
 0x2dd   : > { %v901_v58 = vmul.f32 %v1528_v62, %v900_v1  ;;  %v904_v3 = vsub.f32 1.0, %v903_v63  ;;  %vm922_vm1 = vweird.f32 %v795_v0 }
 0x2de   : > { %v929_v23 = vor.u32 1.1754944e-38, %v928_v17  ;;  %vm927_vm3 = vcmp.eq.f32.partialorder %v926_v21, 8.507059e+37 }
 0x2df   : > { %1058 = vst.msk [vmem:[%s1574_s16 + $0x28] sm:$0xff] %vm1052_vm6, %v901_v58  ;;  %v905_v5 = vmul.f32 %v1316_v59, %v904_v3 }
 0x2e1   : > { %v906_v42 = vadd.f32 %v1316_v59, %v905_v5 }
 0x2e2   : > { %v1318_v8 = vpop.eup %1317 }
 0x2e3   : > { %v910_v11 = vsel %vm909_vm14, %v1316_v59, %v906_v42  ;;  %v918_v12 = vmul.f32 %v1318_v8, %v795_v0  ;;  %v797_v13 = vpop.xlane.xlu0 %796  ;;  %vm923_vm0 = vweird.f32 %v1318_v8 }
 0x2e4   : > { %v915_v16 = vsel %vm912_vm15, %v914_v9, %v910_v11  ;;  %1319 = vrcp.f32 %v797_v13  ;;  %vm924_vm2 = vmor %vm922_vm1, %vm923_vm0  ;;  %v943_v33 = vand.u32 2147483648, %v797_v13  ;;  %v941_v34 = vand.u32 2147483647, %v797_v13 }
 0x2e5   : > { %v916_v62 = vmul.f32 %v1532_v2, %v915_v16  ;;  %v919_v15 = vsub.f32 1.0, %v918_v12  ;;  %vm937_vm5 = vweird.f32 %v797_v13 }
 0x2e6   : > { %v944_v50 = vor.u32 1.1754944e-38, %v943_v33  ;;  %vm942_vm8 = vcmp.eq.f32.partialorder %v941_v34, 8.507059e+37 }
 0x2e7   : > { %1059 = vst.msk [vmem:[%s1574_s16 + $0x30] sm:$0xff] %vm1052_vm6, %v916_v62  ;;  %v920_v19 = vmul.f32 %v1318_v8, %v919_v15 }
 0x2e9   : > { %v921_v22 = vadd.f32 %v1318_v8, %v920_v19 }
 0x2ea   : > { %v1320_v46 = vpop.eup %1319 }
 0x2eb   : > { %v925_v24 = vsel %vm924_vm2, %v1318_v8, %v921_v22  ;;  %v933_v25 = vmul.f32 %v1320_v46, %v797_v13  ;;  %v799_v27 = vpop.xlane.xlu1 %798  ;;  %vm938_vm4 = vweird.f32 %v1320_v46 }
 0x2ec   : > { %v930_v28 = vsel %vm927_vm3, %v929_v23, %v925_v24  ;;  %1321 = vrcp.f32 %v799_v27  ;;  %vm939_vm7 = vmor %vm937_vm5, %vm938_vm4  ;;  %v958_v40 = vand.u32 2147483648, %v799_v27  ;;  %v956_v47 = vand.u32 2147483647, %v799_v27 }
 0x2ed   : > { %v931_v2 = vmul.f32 %v1536_v6, %v930_v28  ;;  %v934_v29 = vsub.f32 1.0, %v933_v25  ;;  %vm952_vm10 = vweird.f32 %v799_v27 }
 0x2ee   : > { %v959_v51 = vor.u32 1.1754944e-38, %v958_v40  ;;  %vm957_vm12 = vcmp.eq.f32.partialorder %v956_v47, 8.507059e+37 }
 0x2ef   : > { %1060 = vst.msk [vmem:[%s1574_s16 + $0x38] sm:$0xff] %vm1052_vm6, %v931_v2  ;;  %v935_v30 = vmul.f32 %v1320_v46, %v934_v29 }
 0x2f1   : > { %v936_v36 = vadd.f32 %v1320_v46, %v935_v30 }
 0x2f2   : > { %v1322_v37 = vpop.eup %1321 }
 0x2f3   : > { %v940_v38 = vsel %vm939_vm7, %v1320_v46, %v936_v36  ;;  %v948_v35 = vmul.f32 %v1322_v37, %v799_v27  ;;  %v801_v39 = vpop.xlane.xlu2 %800  ;;  %vm953_vm9 = vweird.f32 %v1322_v37 }
 0x2f4   : > { %v945_v43 = vsel %vm942_vm8, %v944_v50, %v940_v38  ;;  %1323 = vrcp.f32 %v801_v39  ;;  %vm954_vm11 = vmor %vm952_vm10, %vm953_vm9  ;;  %v973_v57 = vand.u32 2147483648, %v801_v39  ;;  %v971_v60 = vand.u32 2147483647, %v801_v39 }
 0x2f5   : > { %v946_v6 = vmul.f32 %v1540_v10, %v945_v43  ;;  %v949_v44 = vsub.f32 1.0, %v948_v35  ;;  %vm967_vm14 = vweird.f32 %v801_v39 }
 0x2f6   : > { %v974_v0 = vor.u32 1.1754944e-38, %v973_v57  ;;  %vm972_vm0 = vcmp.eq.f32.partialorder %v971_v60, 8.507059e+37 }
 0x2f7   : > { %1061 = vst.msk [vmem:[%s1574_s16 + $0x40] sm:$0xff] %vm1052_vm6, %v946_v6  ;;  %v950_v45 = vmul.f32 %v1322_v37, %v949_v44 }
 0x2f9   : > { %v951_v48 = vadd.f32 %v1322_v37, %v950_v45 }
 0x2fa   : > { %v1324_v49 = vpop.eup %1323 }
 0x2fb   : > { %v955_v54 = vsel %vm954_vm11, %v1322_v37, %v951_v48  ;;  %v963_v52 = vmul.f32 %v1324_v49, %v801_v39  ;;  %v803_v53 = vpop.xlane.xlu0 %802  ;;  %vm968_vm13 = vweird.f32 %v1324_v49 }
 0x2fc   : > { %v960_v55 = vsel %vm957_vm12, %v959_v51, %v955_v54  ;;  %1325 = vrcp.f32 %v803_v53  ;;  %vm969_vm15 = vmor %vm967_vm14, %vm968_vm13  ;;  %v988_v5 = vand.u32 2147483648, %v803_v53  ;;  %v986_v42 = vand.u32 2147483647, %v803_v53 }
 0x2fd   : > { %v961_v10 = vmul.f32 %v1544_v14, %v960_v55  ;;  %v964_v56 = vsub.f32 1.0, %v963_v52  ;;  %vm982_vm2 = vweird.f32 %v803_v53 }
 0x2fe   : > { %v989_v11 = vor.u32 1.1754944e-38, %v988_v5  ;;  %vm987_vm4 = vcmp.eq.f32.partialorder %v986_v42, 8.507059e+37 }
 0x2ff   : > { %1062 = vst.msk [vmem:[%s1574_s16 + $0x48] sm:$0xff] %vm1052_vm6, %v961_v10  ;;  %v965_v59 = vmul.f32 %v1324_v49, %v964_v56 }
 0x301   : > { %v966_v61 = vadd.f32 %v1324_v49, %v965_v59 }
 0x302   : > { %v1326_v63 = vpop.eup %1325 }
 0x303   : > { %v970_v1 = vsel %vm969_vm15, %v1324_v49, %v966_v61  ;;  %v978_v58 = vmul.f32 %v1326_v63, %v803_v53  ;;  %vm983_vm1 = vweird.f32 %v1326_v63 }
 0x304   : > { %v975_v3 = vsel %vm972_vm0, %v974_v0, %v970_v1  ;;  %vm984_vm3 = vmor %vm982_vm2, %vm983_vm1 }
 0x305   : > { %v976_v4 = vmul.f32 %v1548_v18, %v975_v3  ;;  %v979_v14 = vsub.f32 1.0, %v978_v58 }
 0x307   : > { %1063 = vst.msk [vmem:[%s1574_s16 + $0x50] sm:$0xff] %vm1052_vm6, %v976_v4  ;;  %v980_v7 = vmul.f32 %v1326_v63, %v979_v14 }
 0x309   : > { %v981_v8 = vadd.f32 %v1326_v63, %v980_v7  ;;  %v805_v9 = vpop.xlane.xlu1 %804 }
 0x30a   : > { %1327 = vrcp.f32 %v805_v9  ;;  %v1003_v19 = vand.u32 2147483648, %v805_v9  ;;  %v1001_v22 = vand.u32 2147483647, %v805_v9  ;;  %vm997_vm7 = vweird.f32 %v805_v9 }
 0x30b   : > { %v985_v12 = vsel %vm984_vm3, %v1326_v63, %v981_v8 }
 0x30c   : > { %v990_v13 = vsel %vm987_vm4, %v989_v11, %v985_v12  ;;  %v1004_v24 = vor.u32 1.1754944e-38, %v1003_v19  ;;  %vm1002_vm9 = vcmp.eq.f32.partialorder %v1001_v22, 8.507059e+37 }
 0x30d   : > { %v991_v16 = vmul.f32 %v1551_v20, %v990_v13 }
 0x30f   : > { %1064 = vst.msk [vmem:[%s1574_s16 + $0x58] sm:$0xff] %vm1052_vm6, %v991_v16 }
 0x310   : > { %v1328_v18 = vpop.eup %1327 }
 0x311   : > { %v993_v62 = vmul.f32 %v1328_v18, %v805_v9  ;;  %v807_v15 = vpop.xlane.xlu2 %806  ;;  %vm998_vm5 = vweird.f32 %v1328_v18 }
 0x312   : > { %1329 = vrcp.f32 %v807_v15  ;;  %vm999_vm8 = vmor %vm997_vm7, %vm998_vm5  ;;  %v1018_v33 = vand.u32 2147483648, %v807_v15  ;;  %v1016_v34 = vand.u32 2147483647, %v807_v15  ;;  %vm1012_vm11 = vweird.f32 %v807_v15 }
 0x313   : > { %v994_v17 = vsub.f32 1.0, %v993_v62 }
 0x314   : > { %v1019_v50 = vor.u32 1.1754944e-38, %v1018_v33  ;;  %vm1017_vm13 = vcmp.eq.f32.partialorder %v1016_v34, 8.507059e+37 }
 0x315   : > { %v995_v21 = vmul.f32 %v1328_v18, %v994_v17 }
 0x317   : > { %v996_v46 = vadd.f32 %v1328_v18, %v995_v21 }
 0x318   : > { %v1330_v23 = vpop.eup %1329 }
 0x319   : > { %v1000_v25 = vsel %vm999_vm8, %v1328_v18, %v996_v46  ;;  %v1008_v20 = vmul.f32 %v1330_v23, %v807_v15  ;;  %v809_v27 = vpop.xlane.xlu0 %808  ;;  %vm1013_vm10 = vweird.f32 %v1330_v23 }
 0x31a   : > { %v1005_v28 = vsel %vm1002_vm9, %v1004_v24, %v1000_v25  ;;  %1331 = vrcp.f32 %v809_v27  ;;  %vm1014_vm12 = vmor %vm1012_vm11, %vm1013_vm10  ;;  %v1033_v44 = vand.u32 2147483648, %v809_v27  ;;  %v1031_v45 = vand.u32 2147483647, %v809_v27 }
 0x31b   : > { %v1006_v2 = vmul.f32 %v1556_v26, %v1005_v28  ;;  %v1009_v29 = vsub.f32 1.0, %v1008_v20  ;;  %vm1027_vm15 = vweird.f32 %v809_v27 }
 0x31c   : > { %v1034_v49 = vor.u32 1.1754944e-38, %v1033_v44  ;;  %vm1032_vm1 = vcmp.eq.f32.partialorder %v1031_v45, 8.507059e+37 }
 0x31d   : > { %1065 = vst.msk [vmem:[%s1574_s16 + $0x60] sm:$0xff] %vm1052_vm6, %v1006_v2  ;;  %v1010_v30 = vmul.f32 %v1330_v23, %v1009_v29 }
 0x31f   : > { %v1011_v36 = vadd.f32 %v1330_v23, %v1010_v30 }
 0x320   : > { %v1332_v37 = vpop.eup %1331 }
 0x321   : > { %v1015_v38 = vsel %vm1014_vm12, %v1330_v23, %v1011_v36  ;;  %v1023_v35 = vmul.f32 %v1332_v37, %v809_v27  ;;  %v811_v39 = vpop.xlane.xlu1 %810  ;;  %vm1028_vm14 = vweird.f32 %v1332_v37 }
 0x322   : > { %v1020_v43 = vsel %vm1017_vm13, %v1019_v50, %v1015_v38  ;;  %1333 = vrcp.f32 %v811_v39  ;;  %vm1029_vm0 = vmor %vm1027_vm15, %vm1028_vm14  ;;  %v1048_v55 = vand.u32 2147483648, %v811_v39  ;;  %v1046_v56 = vand.u32 2147483647, %v811_v39 }
 0x323   : > { %v1021_v26 = vmul.f32 %v1560_v31, %v1020_v43  ;;  %v1024_v6 = vsub.f32 1.0, %v1023_v35  ;;  %vm1042_vm3 = vweird.f32 %v811_v39 }
 0x324   : > { %v1049_v59 = vor.u32 1.1754944e-38, %v1048_v55  ;;  %vm1047_vm5 = vcmp.eq.f32.partialorder %v1046_v56, 8.507059e+37 }
 0x325   : > { %1066 = vst.msk [vmem:[%s1574_s16 + $0x68] sm:$0xff] %vm1052_vm6, %v1021_v26  ;;  %v1025_v40 = vmul.f32 %v1332_v37, %v1024_v6 }
 0x327   : > { %v1026_v47 = vadd.f32 %v1332_v37, %v1025_v40 }
 0x328   : > { %v1334_v48 = vpop.eup %1333 }
 0x329   : > { %v1030_v51 = vsel %vm1029_vm0, %v1332_v37, %v1026_v47  ;;  %v1038_v54 = vmul.f32 %v1334_v48, %v811_v39  ;;  %vm1043_vm2 = vweird.f32 %v1334_v48 }
 0x32a   : > { %v1035_v52 = vsel %vm1032_vm1, %v1034_v49, %v1030_v51  ;;  %vm1044_vm4 = vmor %vm1042_vm3, %vm1043_vm2 }
 0x32b   : > { %v1036_v31 = vmul.f32 %v1564_v32, %v1035_v52  ;;  %v1039_v53 = vsub.f32 1.0, %v1038_v54 }
 0x32d   : > { %1067 = vst.msk [vmem:[%s1574_s16 + $0x70] sm:$0xff] %vm1052_vm6, %v1036_v31  ;;  %v1040_v10 = vmul.f32 %v1334_v48, %v1039_v53 }
 0x32f   : > { %v1041_v57 = vadd.f32 %v1334_v48, %v1040_v10 }
 0x331   : > { %v1045_v60 = vsel %vm1044_vm4, %v1334_v48, %v1041_v57 }
 0x332   : > { %v1050_v61 = vsel %vm1047_vm5, %v1049_v59, %v1045_v60 }
 0x333   : > { %v1051_v63 = vmul.f32 %v1567_v41, %v1050_v61 }
 0x335   : > { %1068 = vst.msk [vmem:[%s1574_s16 + $0x78] sm:$0xff] %vm1052_vm6, %v1051_v63 }
 0x336 PF: > { %s17_s24 = sadd.s32 1, %s1341_s24  }
 0x337   : > { %p14_p4 = scmp.ge.s32.totalorder %s17_s24, 4  }
 0x339   :  { %16 = sbr.rel (!%p14_p4) target bundleno = 1 (0x1), region = 78 }

</bundles_post_ra>
